<compile_context>
chip_gen: v7x
topology: tpu7x:2x2x1
jax: 0.10.0
libtpu: 0.0.40
codegen_flags: <defaults>
</compile_context>

<pallas_src>
import functools

import jax
import jax.numpy as jnp
from jax import lax
from jax.experimental import pallas as pl
from jax.experimental.pallas import tpu as pltpu


# ---------------------------------------------------------------------------
# Pass 1: fused Q/K/V 1x1-conv projection (hoisted out of the attention loop).
# ---------------------------------------------------------------------------
def _qkv_proj_kernel(x_ref, wq_ref, bq_ref, wk_ref, bk_ref, wv_ref, bv_ref,
                     q_ref, k_ref, vext_ref, *, mxu_dtype):
    x = x_ref[0].astype(mxu_dtype)                                   # (C, t)

    def proj(w_ref, b_ref):
        # 1x1 conv == matmul over channels; MXU with f32 accumulation.
        return lax.dot_general(w_ref[...].astype(mxu_dtype), x,
                               (((1,), (0,)), ((), ())),
                               preferred_element_type=jnp.float32) + b_ref[...]

    q_ref[0] = proj(wq_ref, bq_ref).astype(q_ref.dtype)              # (Cq, t)
    k_ref[0] = proj(wk_ref, bk_ref).astype(k_ref.dtype)              # (Cq, t)
    v = proj(wv_ref, bv_ref)                                         # (C,  t) f32
    C = v.shape[0]
    vext_ref[0, :C, :] = v.astype(vext_ref.dtype)
    # Appended all-ones row: the attention matmul's row C becomes the softmax denominator.
    vext_ref[0, C:, :] = jnp.ones((1, v.shape[1]), dtype=vext_ref.dtype)


# ---------------------------------------------------------------------------
# Pass 2: attention (flash-style online softmax, or plain softmax when the kv
# range fits a single tile) + gamma/residual epilogue.
# ---------------------------------------------------------------------------
def _attn_kernel(gamma_ref, xres_ref, q_ref, k_ref, vext_ref, o_ref, *scratch,
                 mxu_dtype, single_kv):
    C = o_ref.shape[1]                         # output channels (vext has C+1 rows)
    q = q_ref[0].astype(mxu_dtype)             # (Cq, tq)
    v = vext_ref[0]                            # (C+1, tkv) already in mxu_dtype
    # logits s[j, i] = sum_c k[c, j] * q[c, i]  -> (tkv, tq).
    # Only the tiny (Cq, tkv) operand is transposed; the transpose is done in f32 (the
    # robust Mosaic path for small sublane counts) and then cast to the MXU dtype.
    k_t = k_ref[0].astype(jnp.float32).T.astype(mxu_dtype)           # (tkv, Cq)
    s = lax.dot_general(k_t, q, (((1,), (0,)), ((), ())),
                        preferred_element_type=jnp.float32)          # (tkv, tq) f32

    def epilogue(acc):
        # acc: (C+1, tq); row C holds the softmax denominator.  Exact reciprocal, applied
        # once per q-tile (finalize only), so no approx-reciprocal error in the result.
        inv_l = pl.reciprocal(acc[C:C + 1, :], approx=False)         # (1, tq)
        out = acc[:C, :] * inv_l                                     # (C, tq)
        o_ref[0] = (gamma_ref[0] * out
                    + xres_ref[0].astype(jnp.float32)).astype(o_ref.dtype)

    if single_kv:
        # Whole kv range in one tile: plain softmax, no online bookkeeping / scratch.
        m = jnp.max(s, axis=0, keepdims=True)                        # (1, tq)
        p = jnp.exp(s - m)                                           # (tkv, tq)
        acc = lax.dot_general(v, p.astype(mxu_dtype), (((1,), (0,)), ((), ())),
                              preferred_element_type=jnp.float32)    # (C+1, tq)
        epilogue(acc)
    else:
        m_scr, acc_scr = scratch                                     # (1,tq), (C+1,tq)
        ikv = pl.program_id(2)

        @pl.when(ikv == 0)
        def _():
            m_scr[...] = jnp.full_like(m_scr, -jnp.inf)
            acc_scr[...] = jnp.zeros_like(acc_scr)

        m_prev = m_scr[...]
        m_new = jnp.maximum(m_prev, jnp.max(s, axis=0, keepdims=True))
        alpha = jnp.exp(m_prev - m_new)                              # (1, tq)
        p = jnp.exp(s - m_new)                                       # (tkv, tq)
        # One MXU call updates both the (C, tq) numerator and (row C) the running
        # softmax denominator (v's appended ones row).
        acc_scr[...] = alpha * acc_scr[...] + lax.dot_general(
            v, p.astype(mxu_dtype), (((1,), (0,)), ((), ())),
            preferred_element_type=jnp.float32)
        m_scr[...] = m_new

        @pl.when(ikv == pl.num_programs(2) - 1)
        def _():
            epilogue(acc_scr[...])


def _pick_block(n, target):
    """Largest multiple-of-128 divisor of n that is <= target, else n itself."""
    if n <= target:
        return n
    t = (target // 128) * 128
    while t >= 128:
        if n % t == 0:
            return t
        t -= 128
    # TODO(synk): pad + mask the q/kv axes for HW with no 128-multiple divisor instead of
    # falling back to a full-extent tile (can blow the VMEM plan on v7x's 64 MiB).
    return n


def self_attention_pallas(x, wq, bq, wk, bk, wv, bv, gamma, *,
                          block_q=256, block_kv=256, block_proj=512,
                          max_single_kv=2048, use_bf16_mxu=True,
                          kv_buffer_count=2, vmem_limit_mb=32):
    """SAGAN self-attention forward.

    x: (B, C, H, W) NCHW; w*: (Cout, Cin) 1x1-conv weights; b*: (Cout,); gamma: (1,).

    Generation tuning:
      v6e : block_kv >= 256 (256-deep MXU), block_q 256-512 (defaults).
      v7x : block_q/kv 256-512; keep vmem_limit_mb ~32 (64 MiB/TC physical) and ensure
            B * (HW // block_q) >= 2 so both TensorCores get work.
      v5e : block_kv = 128 already fills the MXU; raise block_q to 512-1024 (and the VMEM
            limit) to cut KV-side HBM reads on the slower HBM.
      use_bf16_mxu=True feeds the MXU bf16 operands with f32 accumulation when the input
            is f32 (2-4x on the matmul-bound part); set False for f32-exact numerics.
      kv_buffer_count=3 deepens K/V pipelining if profiling shows exposed DMA at low C.
    """
    B, C, H, W = x.shape
    HW = H * W
    Cq = wq.shape[0]

    x_flat = x.reshape(B, C, HW)                     # free reshape, no transpose

    if use_bf16_mxu and x.dtype == jnp.float32:
        mxu_dtype = jnp.bfloat16
    else:
        mxu_dtype = x.dtype
    qk_dtype = x.dtype          # small Q/K stored in input precision (tiny HBM footprint)
    v_dtype = mxu_dtype         # V dominates kv-side traffic -> store in the MXU dtype

    vmem_limit = vmem_limit_mb * 1024 * 1024

    # ---------------- Pass 1: Q/K/V projections (computed once per element) ----------------
    tp = _pick_block(HW, block_proj)
    q_all, k_all, vext_all = pl.pallas_call(
        functools.partial(_qkv_proj_kernel, mxu_dtype=mxu_dtype),
        out_shape=(jax.ShapeDtypeStruct((B, Cq, HW), qk_dtype),
                   jax.ShapeDtypeStruct((B, Cq, HW), qk_dtype),
                   jax.ShapeDtypeStruct((B, C + 1, HW), v_dtype)),
        grid=(B, HW // tp),
        in_specs=[
            pl.BlockSpec((1, C, tp), lambda b, i: (b, 0, i)),         # x columns
            pl.BlockSpec((Cq, C), lambda b, i: (0, 0)),               # Wq
            pl.BlockSpec((Cq, 1), lambda b, i: (0, 0)),               # bq
            pl.BlockSpec((Cq, C), lambda b, i: (0, 0)),               # Wk
            pl.BlockSpec((Cq, 1), lambda b, i: (0, 0)),               # bk
            pl.BlockSpec((C, C), lambda b, i: (0, 0)),                # Wv
            pl.BlockSpec((C, 1), lambda b, i: (0, 0)),                # bv
        ],
        out_specs=(
            pl.BlockSpec((1, Cq, tp), lambda b, i: (b, 0, i)),
            pl.BlockSpec((1, Cq, tp), lambda b, i: (b, 0, i)),
            pl.BlockSpec((1, C + 1, tp), lambda b, i: (b, 0, i)),
        ),
        compiler_params=pltpu.CompilerParams(
            dimension_semantics=("parallel", "parallel"),
            vmem_limit_bytes=vmem_limit),
    )(x_flat, wq, bq.reshape(Cq, 1), wk, bk.reshape(Cq, 1), wv, bv.reshape(C, 1))

    # ---------------- Pass 2: attention + gamma/residual epilogue ----------------
    tq = _pick_block(HW, block_q)
    if HW <= max_single_kv:
        tkv = HW                 # single kv tile -> plain softmax, no flash bookkeeping
    else:
        tkv = _pick_block(HW, block_kv)
    single_kv = (tkv == HW)

    def _kv_spec(shape, imap):
        # Optional deeper pipelining of the small per-step K/V tiles (review item #11).
        if kv_buffer_count != 2:
            return pl.BlockSpec(shape, imap, pipeline_mode=pl.Buffered(kv_buffer_count))
        return pl.BlockSpec(shape, imap)

    scratch_shapes = [] if single_kv else [
        pltpu.VMEM((1, tq), jnp.float32),            # running max m
        pltpu.VMEM((C + 1, tq), jnp.float32),        # fused numerator + denominator row
    ]

    out_flat = pl.pallas_call(
        functools.partial(_attn_kernel, mxu_dtype=mxu_dtype, single_kv=single_kv),
        out_shape=jax.ShapeDtypeStruct((B, C, HW), x.dtype),
        grid=(B, HW // tq, HW // tkv),               # reduction (kv) axis last
        in_specs=[
            pl.BlockSpec(memory_space=pltpu.SMEM),                        # gamma (1,)
            pl.BlockSpec((1, C, tq), lambda b, i, j: (b, 0, i)),          # x residual cols
            pl.BlockSpec((1, Cq, tq), lambda b, i, j: (b, 0, i)),         # Q (resident over kv)
            _kv_spec((1, Cq, tkv), lambda b, i, j: (b, 0, j)),            # K
            _kv_spec((1, C + 1, tkv), lambda b, i, j: (b, 0, j)),         # V (+ ones row)
        ],
        out_specs=pl.BlockSpec((1, C, tq), lambda b, i, j: (b, 0, i)),    # resident over kv
        scratch_shapes=scratch_shapes,
        compiler_params=pltpu.CompilerParams(
            dimension_semantics=("parallel", "parallel", "arbitrary"),
            vmem_limit_bytes=vmem_limit),
    )(gamma.astype(jnp.float32), x_flat, q_all, k_all, vext_all)

    return out_flat.reshape(B, C, H, W)


def self_attention_ref(x, wq, bq, wk, bk, wv, bv, gamma):
    """Pure-JAX reference mirroring the PyTorch forward exactly (NCHW)."""
    B, C, H, W = x.shape
    HW = H * W

    def proj(w, b):
        y = jnp.einsum('oc,bchw->bohw', w, x).reshape(B, -1, HW)
        return y + b[None, :, None]

    q = proj(wq, bq).transpose(0, 2, 1)                                 # (B, HW, Cq)
    k = proj(wk, bk)                                                    # (B, Cq, HW)
    v = proj(wv, bv)                                                    # (B, C, HW)
    attn = jax.nn.softmax(jnp.einsum('bic,bcj->bij', q, k), axis=-1)    # (B, HW, HW)
    out = jnp.einsum('bcj,bij->bci', v, attn).reshape(B, C, H, W)
    return gamma[0] * out + x


if __name__ == "__main__":
    B, C, H, W = 2, 16, 16, 16      # HW = 256
    Cq = C // 8

    key = jax.random.PRNGKey(0)
    kx, kq, kbq, kk, kbk, kvw, kbv = jax.random.split(key, 7)

    x = jax.random.normal(kx, (B, C, H, W), dtype=jnp.float32)
    wq = 0.1 * jax.random.normal(kq, (Cq, C), dtype=jnp.float32)
    bq = 0.1 * jax.random.normal(kbq, (Cq,), dtype=jnp.float32)
    wk = 0.1 * jax.random.normal(kk, (Cq, C), dtype=jnp.float32)
    bk = 0.1 * jax.random.normal(kbk, (Cq,), dtype=jnp.float32)
    wv = 0.1 * jax.random.normal(kvw, (C, C), dtype=jnp.float32)
    bv = 0.1 * jax.random.normal(kbv, (C,), dtype=jnp.float32)
    # PyTorch inits gamma to 0 (output == x); use a nonzero value so the attention path
    # is actually exercised by the checks.
    gamma = jnp.array([0.5], dtype=jnp.float32)

    ref = self_attention_ref(x, wq, bq, wk, bk, wv, bv, gamma)

    # 1) f32-exact MXU, single-kv-tile fast path (HW=256 <= max_single_kv).
    out = self_attention_pallas(x, wq, bq, wk, bk, wv, bv, gamma, use_bf16_mxu=False)
    out = jax.block_until_ready(out)
    assert out.shape == (B, C, H, W)
    assert jnp.allclose(out, ref, rtol=2e-4, atol=2e-4), "mismatch (exact, single-kv)"

    # 2) f32-exact MXU, forced flash/online-softmax path (2 q-tiles x 2 kv-tiles).
    out2 = self_attention_pallas(x, wq, bq, wk, bk, wv, bv, gamma,
                                 block_q=128, block_kv=128, max_single_kv=128,
                                 use_bf16_mxu=False)
    out2 = jax.block_until_ready(out2)
    assert jnp.allclose(out2, ref, rtol=2e-4, atol=2e-4), "mismatch (exact, flash path)"

    # 3) bf16-fed MXU with f32 accumulation (default fast mode); looser tolerance for
    #    the bf16 operand rounding.
    out3 = self_attention_pallas(x, wq, bq, wk, bk, wv, bv, gamma, use_bf16_mxu=True)
    out3 = jax.block_until_ready(out3)
    assert jnp.allclose(out3, ref, rtol=3e-2, atol=3e-2), "mismatch (bf16 MXU)"

    print("KERNEL_OK")
</pallas_src>

<mosaic_0001>
module attributes {stable_mosaic.version = 11 : i64} {
  func.func @_qkv_proj_kernel(%arg0: i32, %arg1: i32, %arg2: memref<1x16x256xf32, #tpu.memory_space<vmem>>, %arg3: memref<2x16xf32, #tpu.memory_space<vmem>>, %arg4: memref<2x1xf32, #tpu.memory_space<vmem>>, %arg5: memref<2x16xf32, #tpu.memory_space<vmem>>, %arg6: memref<2x1xf32, #tpu.memory_space<vmem>>, %arg7: memref<16x16xf32, #tpu.memory_space<vmem>>, %arg8: memref<16x1xf32, #tpu.memory_space<vmem>>, %arg9: memref<1x2x256xf32, #tpu.memory_space<vmem>>, %arg10: memref<1x2x256xf32, #tpu.memory_space<vmem>>, %arg11: memref<1x17x256xf32, #tpu.memory_space<vmem>>) attributes {dimension_semantics = [#tpu.dimension_semantics<parallel>, #tpu.dimension_semantics<parallel>], iteration_bounds = array<i64: 2, 1>, scalar_prefetch = 0 : i64, scratch_operands = 0 : i64, tpu.core_type = #tpu.core_type<tc>, window_params = [{transform_indices = @transform_0, window_bounds = array<i64: 1, 16, 256>}, {pipeline_mode = #tpu.pipeline_mode<synchronous>, transform_indices = @transform_1, window_bounds = array<i64: 2, 16>}, {pipeline_mode = #tpu.pipeline_mode<synchronous>, transform_indices = @transform_2, window_bounds = array<i64: 2, 1>}, {pipeline_mode = #tpu.pipeline_mode<synchronous>, transform_indices = @transform_3, window_bounds = array<i64: 2, 16>}, {pipeline_mode = #tpu.pipeline_mode<synchronous>, transform_indices = @transform_4, window_bounds = array<i64: 2, 1>}, {pipeline_mode = #tpu.pipeline_mode<synchronous>, transform_indices = @transform_5, window_bounds = array<i64: 16, 16>}, {pipeline_mode = #tpu.pipeline_mode<synchronous>, transform_indices = @transform_6, window_bounds = array<i64: 16, 1>}, {transform_indices = @transform_7, window_bounds = array<i64: 1, 2, 256>}, {transform_indices = @transform_8, window_bounds = array<i64: 1, 2, 256>}, {transform_indices = @transform_9, window_bounds = array<i64: 1, 17, 256>}]} {
    %c0 = arith.constant 0 : index
    %c0_0 = arith.constant 0 : index
    %c0_1 = arith.constant 0 : index
    %0 = vector.load %arg2[%c0, %c0_0, %c0_1] : memref<1x16x256xf32, #tpu.memory_space<vmem>>, vector<1x16x256xf32>
    %1 = vector.shape_cast %0 : vector<1x16x256xf32> to vector<16x256xf32>
    %c0_2 = arith.constant 0 : index
    %c0_3 = arith.constant 0 : index
    %2 = vector.load %arg3[%c0_2, %c0_3] : memref<2x16xf32, #tpu.memory_space<vmem>>, vector<2x16xf32>
    %cst = arith.constant dense<0.000000e+00> : vector<2x256xf32>
    %3 = tpu.matmul %2, %1, %cst {dimension_numbers = #tpu.dot_dimension_numbers<[1], [0], [0], [1], [0, 0, 1, 1], [], []>} : vector<2x16xf32>, vector<16x256xf32>, vector<2x256xf32> -> vector<2x256xf32>
    %c0_4 = arith.constant 0 : index
    %c0_5 = arith.constant 0 : index
    %4 = vector.load %arg4[%c0_4, %c0_5] : memref<2x1xf32, #tpu.memory_space<vmem>>, vector<2x1xf32>
    %5 = vector.broadcast %4 : vector<2x1xf32> to vector<2x256xf32>
    %6 = arith.addf %3, %5 : vector<2x256xf32>
    %c0_6 = arith.constant 0 : index
    %c0_7 = arith.constant 0 : index
    %c0_8 = arith.constant 0 : index
    %7 = vector.load %arg9[%c0_6, %c0_7, %c0_8] : memref<1x2x256xf32, #tpu.memory_space<vmem>>, vector<1x2x256xf32>
    %8 = vector.shape_cast %7 : vector<1x2x256xf32> to vector<2x256xf32>
    %9 = vector.shape_cast %6 : vector<2x256xf32> to vector<1x2x256xf32>
    tpu.vector_store %arg9[%c0_6, %c0_7, %c0_8], %9 {strides = array<i32>} : memref<1x2x256xf32, #tpu.memory_space<vmem>>, vector<1x2x256xf32>,
    %c0_9 = arith.constant 0 : index
    %c0_10 = arith.constant 0 : index
    %10 = vector.load %arg5[%c0_9, %c0_10] : memref<2x16xf32, #tpu.memory_space<vmem>>, vector<2x16xf32>
    %cst_11 = arith.constant dense<0.000000e+00> : vector<2x256xf32>
    %11 = tpu.matmul %10, %1, %cst_11 {dimension_numbers = #tpu.dot_dimension_numbers<[1], [0], [0], [1], [0, 0, 1, 1], [], []>} : vector<2x16xf32>, vector<16x256xf32>, vector<2x256xf32> -> vector<2x256xf32>
    %c0_12 = arith.constant 0 : index
    %c0_13 = arith.constant 0 : index
    %12 = vector.load %arg6[%c0_12, %c0_13] : memref<2x1xf32, #tpu.memory_space<vmem>>, vector<2x1xf32>
    %13 = vector.broadcast %12 : vector<2x1xf32> to vector<2x256xf32>
    %14 = arith.addf %11, %13 : vector<2x256xf32>
    %c0_14 = arith.constant 0 : index
    %c0_15 = arith.constant 0 : index
    %c0_16 = arith.constant 0 : index
    %15 = vector.load %arg10[%c0_14, %c0_15, %c0_16] : memref<1x2x256xf32, #tpu.memory_space<vmem>>, vector<1x2x256xf32>
    %16 = vector.shape_cast %15 : vector<1x2x256xf32> to vector<2x256xf32>
    %17 = vector.shape_cast %14 : vector<2x256xf32> to vector<1x2x256xf32>
    tpu.vector_store %arg10[%c0_14, %c0_15, %c0_16], %17 {strides = array<i32>} : memref<1x2x256xf32, #tpu.memory_space<vmem>>, vector<1x2x256xf32>,
    %c0_17 = arith.constant 0 : index
    %c0_18 = arith.constant 0 : index
    %18 = vector.load %arg7[%c0_17, %c0_18] : memref<16x16xf32, #tpu.memory_space<vmem>>, vector<16x16xf32>
    %cst_19 = arith.constant dense<0.000000e+00> : vector<16x256xf32>
    %19 = tpu.matmul %18, %1, %cst_19 {dimension_numbers = #tpu.dot_dimension_numbers<[1], [0], [0], [1], [0, 0, 1, 1], [], []>} : vector<16x16xf32>, vector<16x256xf32>, vector<16x256xf32> -> vector<16x256xf32>
    %c0_20 = arith.constant 0 : index
    %c0_21 = arith.constant 0 : index
    %20 = vector.load %arg8[%c0_20, %c0_21] : memref<16x1xf32, #tpu.memory_space<vmem>>, vector<16x1xf32>
    %21 = vector.broadcast %20 : vector<16x1xf32> to vector<16x256xf32>
    %22 = arith.addf %19, %21 : vector<16x256xf32>
    %c0_22 = arith.constant 0 : index
    %c0_23 = arith.constant 0 : index
    %c0_24 = arith.constant 0 : index
    %23 = vector.load %arg11[%c0_22, %c0_23, %c0_24] : memref<1x17x256xf32, #tpu.memory_space<vmem>>, vector<1x16x256xf32>
    %24 = vector.shape_cast %23 : vector<1x16x256xf32> to vector<16x256xf32>
    %25 = vector.shape_cast %22 : vector<16x256xf32> to vector<1x16x256xf32>
    tpu.vector_store %arg11[%c0_22, %c0_23, %c0_24], %25 {strides = array<i32>} : memref<1x17x256xf32, #tpu.memory_space<vmem>>, vector<1x16x256xf32>,
    %cst_25 = arith.constant 1.000000e+00 : f32
    %26 = vector.broadcast %cst_25 : f32 to vector<1x256xf32>
    %c0_26 = arith.constant 0 : index
    %c16 = arith.constant 16 : index
    %c0_27 = arith.constant 0 : index
    %27 = vector.load %arg11[%c0_26, %c16, %c0_27] : memref<1x17x256xf32, #tpu.memory_space<vmem>>, vector<1x1x256xf32>
    %28 = vector.shape_cast %27 : vector<1x1x256xf32> to vector<1x256xf32>
    %29 = vector.shape_cast %26 : vector<1x256xf32> to vector<1x1x256xf32>
    tpu.vector_store %arg11[%c0_26, %c16, %c0_27], %29 {strides = array<i32>} : memref<1x17x256xf32, #tpu.memory_space<vmem>>, vector<1x1x256xf32>,
    return
  }
  func.func @transform_0(%arg0: i32, %arg1: i32) -> (i32, i32, i32) {
    %c0_i32 = arith.constant 0 : i32
    %c0_i32_0 = arith.constant 0 : i32
    return %arg0, %c0_i32, %arg1 : i32, i32, i32
  }
  func.func @transform_1(%arg0: i32, %arg1: i32) -> (i32, i32) {
    %c0_i32 = arith.constant 0 : i32
    %c0_i32_0 = arith.constant 0 : i32
    %c0_i32_1 = arith.constant 0 : i32
    return %c0_i32, %c0_i32_0 : i32, i32
  }
  func.func @transform_2(%arg0: i32, %arg1: i32) -> (i32, i32) {
    %c0_i32 = arith.constant 0 : i32
    %c0_i32_0 = arith.constant 0 : i32
    %c0_i32_1 = arith.constant 0 : i32
    return %c0_i32, %c0_i32_0 : i32, i32
  }
  func.func @transform_3(%arg0: i32, %arg1: i32) -> (i32, i32) {
    %c0_i32 = arith.constant 0 : i32
    %c0_i32_0 = arith.constant 0 : i32
    %c0_i32_1 = arith.constant 0 : i32
    return %c0_i32, %c0_i32_0 : i32, i32
  }
  func.func @transform_4(%arg0: i32, %arg1: i32) -> (i32, i32) {
    %c0_i32 = arith.constant 0 : i32
    %c0_i32_0 = arith.constant 0 : i32
    %c0_i32_1 = arith.constant 0 : i32
    return %c0_i32, %c0_i32_0 : i32, i32
  }
  func.func @transform_5(%arg0: i32, %arg1: i32) -> (i32, i32) {
    %c0_i32 = arith.constant 0 : i32
    %c0_i32_0 = arith.constant 0 : i32
    %c0_i32_1 = arith.constant 0 : i32
    return %c0_i32, %c0_i32_0 : i32, i32
  }
  func.func @transform_6(%arg0: i32, %arg1: i32) -> (i32, i32) {
    %c0_i32 = arith.constant 0 : i32
    %c0_i32_0 = arith.constant 0 : i32
    %c0_i32_1 = arith.constant 0 : i32
    return %c0_i32, %c0_i32_0 : i32, i32
  }
  func.func @transform_7(%arg0: i32, %arg1: i32) -> (i32, i32, i32) {
    %c0_i32 = arith.constant 0 : i32
    %c0_i32_0 = arith.constant 0 : i32
    return %arg0, %c0_i32, %arg1 : i32, i32, i32
  }
  func.func @transform_8(%arg0: i32, %arg1: i32) -> (i32, i32, i32) {
    %c0_i32 = arith.constant 0 : i32
    %c0_i32_0 = arith.constant 0 : i32
    return %arg0, %c0_i32, %arg1 : i32, i32, i32
  }
  func.func @transform_9(%arg0: i32, %arg1: i32) -> (i32, i32, i32) {
    %c0_i32 = arith.constant 0 : i32
    %c0_i32_0 = arith.constant 0 : i32
    return %arg0, %c0_i32, %arg1 : i32, i32, i32
  }
}

</mosaic_0001>

<bundles_post_ra>
// kernel: tpu_custom_call.1
= control target key start
LH: loop header
LB: loop body
LE: loop exit
PB: predicated region body
PF: predicated region fallthrough
CT: control target
= control target key end

     0   :  { %s1488_s0 = inlined_call_operand.hbm [shape: f32[2,16,256], index: 0, kind: input, shape index: {}]   ;;  %s1489_s1 = inlined_call_operand.vmem [shape: f32[2,16], index: 1, kind: input, shape index: {}]   ;;  %s1490_s2 = inlined_call_operand.vmem [shape: f32[2,1], index: 2, kind: input, shape index: {}]   ;;  %s1491_s3 = inlined_call_operand.vmem [shape: f32[2,16], index: 3, kind: input, shape index: {}]   ;;  %s1492_s4 = inlined_call_operand.vmem [shape: f32[2,1], index: 4, kind: input, shape index: {}]   ;;  %s1493_s5 = inlined_call_operand.vmem [shape: f32[16,16], index: 5, kind: input, shape index: {}]   ;;  %s1494_s6 = inlined_call_operand.vmem [shape: f32[16,1], index: 6, kind: input, shape index: {}]   ;;  %s1495_s7 = inlined_call_operand.hbm [shape: f32[2,2,256], index: 7, kind: output, shape index: {0}]   ;;  %s1496_s8 = inlined_call_operand.hbm [shape: f32[2,2,256], index: 8, kind: output, shape index: {1}]   ;;  %s1497_s9 = inlined_call_operand.vmem [shape: f32[2,17,256], index: 9, kind: output, shape index: {2}]  }
   0x1   :  { %1501 = sst [smem:[#allocation12_spill]] %s1488_s0 }
   0x2   :  { %1502 = sst [smem:[#allocation13_spill]] %s1489_s1 }
   0x3   :  { %15 = vsyncpa [#allocation3], 0 }
   0x4   :  { %17 = vsyncpa [#allocation3 + $0x1], 0 }
   0x5   :  { %18 = vsyncpa [#allocation4], 0 }
   0x6   :  { %20 = vsyncpa [#allocation4 + $0x1], 0 }
   0x7   :  { %21 = vsyncpa [#allocation7], 0 }
   0x8   :  { %23 = vsyncpa [#allocation7 + $0x1], 0  ;;  %s1235_s30 = smov 0   ;;  %s1237_s10 = smov 0  }
   0x9   :  { %s1239_s11 = smov 0   ;;  %s1241_s12 = smov 0  }
   0xa   :  { %s1243_s13 = smov 0   ;;  %s1245_s14 = smov 0  }
   0xb LB: > { %s914_s15 = sadd.s32 4294967295, %s1175_s14   ;;  %s915_s16 = sadd.s32 4294967294, %s1175_s14   ;;  %s1175_s14 = sphi %s1245_s14, %s29_s14   ;;  %s1171_s13 = sphi %s1243_s13, %s1522_s13   ;;  %s1167_s12 = sphi %s1241_s12, %s1521_s12   ;;  %s1163_s11 = sphi %s1239_s11, %s1520_s11   ;;  %s1159_s10 = sphi %s1237_s10, %s1519_s10   ;;  %s1155_s30 = sphi %s1235_s30, %s1518_s30  }
   0xc   : > { %s41_s17 = sadd.s32 1, %s1171_s13  ;;  %s50_s18 = sadd.s32 1, %s1163_s11 }
   0xd   : > { %p43_p0 = scmp.ge.s32.totalorder %s41_s17, 2  ;;  %p57_p1 = scmp.ne.s32.totalorder %s1163_s11, %s1159_s10 }
   0xe   : > { %p58_p2 = scmp.eq.s32.totalorder %s1175_s14, 0  ;;  %p63_p3 = scmp.ne.s32.totalorder %s1159_s10, %s1155_s30 }
   0xf   : > { %s1524_s17 = smov (%p43_p0, %s41_s17), 0  ;;  %p64_p5 = scmp.eq.s32.totalorder %s914_s15, 0 }
  0x10   : > { %1503 = sst [smem:[#allocation11_spill]] %s1524_s17  ;;  %p1276_p4 = por %p58_p2, %p57_p1 }
  0x11   : > { %s45_s20 = ssub.s32 %s1171_s13, %s1524_s17  ;;  %p215_p6 = scmp.eq.s32.totalorder %s914_s15, 1 }
  0x12   : > { %p48_p7 = scmp.eq.s32.totalorder %s45_s20, 0  ;;  %p1282_p8 = por %p64_p5, %p63_p3 }
  0x13   : > { %p1286_p9 = por %p215_p6, %p57_p1  ;;  %p221_p10 = scmp.eq.s32.totalorder %s915_s16, 1 }
  0x14   : > { %s1291_s23 = scalar_select %p48_p7, %s1163_s11, %s50_s18  }
  0x15   : > { %s1506_s22 = scalar_select %p1286_p9, 1, 0 }
  0x16   : > { %p1293_p11 = por %p221_p10, %p63_p3  ;;  %p974_p13 = scmp.lt.s32.totalorder %s1175_s14, 2 }
  0x17   : > { %s315_s25 = sand.u32 1, %s1163_s11   ;;  %s941_s27 = sshll.u32 %s1171_s13, 9 }
  0x18   : > { %s1507_s24 = scalar_select %p1293_p11, 1, 0 }
  0x19   : > { %s918_s26 = sshll.u32 %s315_s25, 5  ;;  %s1508_s0 = sld [smem:[#allocation12_spill]] }
  0x1a   : > { %s319_s16 = scalar_lea.vmem [#allocation2], %s918_s26  ;;  %p1310_p0 = pnand %p974_p13, %p1276_p4 }
  0x1b   : > { %s328_s18 = sshll.u32 %s319_s16, 4  ;;  %s1315_s17 = scalar_lea.sflag [#allocation3], %s315_s25  ;;  %s1306_s18 = int_to_ptr.vmem [resolvable:$true] %s328_s18 }
  0x1c   : > { %p1033_p3 = pneg %p1310_p0 }
  0x1f   : > { %s1304_s15 = scalar_lea.hbm %s1508_s0, %s941_s27  ;;  %s1036_s19 = scalar_lea.hbm %s1508_s0, 1024 }
  0x20   : > { %s1031_s27 = scalar_lea.hbm %s1304_s15, 512  ;;  %p1037_p4 = scmp.lt.u32.totalorder %s1304_s15, %s1508_s0 }
  0x21   : > { %p1032_p2 = scmp.ne.s32.totalorder %s1304_s15, %s1031_s27  ;;  %p1038_p7 = scmp.lt.u32.totalorder %s1036_s19, %s1031_s27 }
  0x22   : > { %p1040_p13 = scmp.lt.u32.totalorder %s1031_s27, %s1304_s15 }
  0x23   : > { %p1034_p5 = pnand %p1033_p3, %p1032_p2  ;;  %p1039_p10 = por %p1038_p7, %p1037_p4 }
  0x25   : > { %p1035_p6 = pneg %p1034_p5  ;;  %p1041_p12 = por %p1040_p13, %p1039_p10 }
  0x27   : > { %p1042_p1 = pnand %p1041_p12, %p1035_p6 }
  0x29   : > { %1045 = shalt.err (!%p1042_p1)
}
  0x2a   : > { %s1046_s25 = scalar_lea.vmem %s1306_s18, 512  ;;  %s1177_s26 = smov [#allocation2]  }
  0x2b   : > { %p1047_p2 = scmp.ne.s32.totalorder %s1306_s18, %s1046_s25  ;;  %s1051_s28 = sshll.u32 %s1177_s26, 4  ;;  %s1052_s28 = int_to_ptr.vmem [resolvable:$false] %s1051_s28 }
  0x2c   : > { %s1053_s29 = scalar_lea.vmem %s1052_s28, 1024  ;;  %p1054_p9 = scmp.lt.s32.totalorder %s1306_s18, %s1052_s28 }
  0x2d   : > { %p1049_p5 = pnand %p1047_p2, %p1033_p3  ;;  %p1055_p4 = scmp.lt.s32.totalorder %s1053_s29, %s1046_s25 }
  0x2f   : > { %p1050_p11 = pneg %p1049_p5  ;;  %p1056_p7 = por %p1055_p4, %p1054_p9 }
  0x31   : > { %p1057_p10 = pnand %p1056_p7, %p1050_p11 }
  0x33   : > { %1060 = shalt.err (!%p1057_p10)
}
  0x34   : > { %s1178_s27 = smov 256   ;;  %s1179_s19 = smov 16  }
  0x35   : > { %966 = dma.hbm_to_vmem [thread:$0]  (!%p1310_p0), %s1304_s15, 512, %s1306_s18, %s1315_s17, %s1178_s27, %s1178_s27, %s1179_s19  }
  0x36   : > { %p336_p12 = scmp.lt.s32.totalorder %s1175_s14, 3  ;;  %p1510_p1 = scmp.ge.s32.totalorder %s1175_s14, 1 }
  0x38   : > { %p337_p3 = pnand %p1510_p1, %p336_p12 }
  0x39   : > { %s1347_s16 = sand.u32 (!%p337_p3), 1, %s1159_s10  }
  0x3a   : > { %340 = sbr.rel (%p337_p3) target bundleno = 329 (0x149), region = 48  ;;  %s922_s25 = sshll.u32 (!%p337_p3), %s1347_s16, 5 }
  0x3b   : > { %s343_s26 = scalar_lea.sflag (!%p337_p3), [#allocation3], %s1347_s16  ;;  %s346_s28 = scalar_lea.vmem (!%p337_p3), [#allocation2], %s922_s25 }
  0x41   : > { %1142 = dma.done.wait (%p1282_p8), %s343_s26, 512  }
  0x42   : > { %1144 = vsyncadd (%p1282_p8), %s343_s26, 4294966784  ;;  %v1180_v0 = vmov 0.0   ;;  %v1181_v1 = vmov 0   ;;  %v409_v2 = vld [vmem:[%s346_s28 + $0x8] sm:$0xff]  ;;  %v411_v3 = vld [vmem:[%s346_s28 + $0x18] sm:$0xff]  ;;  %s1511_s1 = sld [smem:[#allocation13_spill]]  ;;  %v700_v16 = vlaneseq }
  0x43   : > { %487 = vmatprep.mubr.f32.mxu1 %v1180_v0  ;;  %683 = vmatprep.mubr.f32.mxu0 %v1180_v0  ;;  %v408_v4 = vld [vmem:[%s346_s28] sm:$0xff]  ;;  %v944_v5 = vpack.c.bf16 %v411_v3, %v409_v2  ;;  %v410_v6 = vld [vmem:[%s346_s28 + $0x10] sm:$0xff]  ;;  %vm419_vm0 = vcmask 130048   ;;  %v602_v13 = vld [vmem:[%s1494_s6 + $0x8] sm:$0xff]  ;;  %p399_p8 = scmp.lt.s32.totalorder %s1167_s12, 1  ;;  %v1182_v17 = vmov 1.0  }
  0x44   : > { %1029 = vset.pattern.permute.xlu0 %v1181_v1  ;;  %1030 = vset.pattern.permute.xlu1 %v1181_v1  ;;  %v946_v7 = vpack.c.bf16 %v410_v6, %v408_v4  ;;  %v413_v8 = vld [vmem:[%s1490_s2] sm:$0x3]  ;;  %v600_v15 = vld [vmem:[%s1493_s5 + $0x8] sm:$0xff]  ;;  %vm702_vm1 = vcmp.lt.s32.totalorder %v700_v16, 256  ;;  %s923_s28 = sshll.u32 %s1347_s16, 2  ;;  %s1500_s17 = sshll.u32 %s1167_s12, 6 }
  0x45   : > { %945 = vmatprep.subr.bf16.mxu1 %v944_v5  ;;  %953 = vmatprep.subr.bf16.mxu0 %v944_v5  ;;  %v601_v9 = vld [vmem:[%s1494_s6] sm:$0xff]  ;;  %s400_s29 = scalar_select %p399_p8, %s1167_s12, 1 }
  0x46   : > { %947 = vmatpush1.bf16.msra.mxu1 %v946_v7  ;;  %955 = vmatpush1.bf16.msra.mxu0 %v946_v7  ;;  %v599_v11 = vld [vmem:[%s1493_s5] sm:$0xff]  ;;  %s376_s15 = scalar_lea.vmem [#allocation5], %s923_s28  ;;  %s708_s25 = scalar_lea.sflag [#allocation4], %s1347_s16 }
  0x47   : > { %949 = vmatprep.subr.bf16.mxu1 %v944_v5  ;;  %416 = vperm.xlu0 %1029, %v413_v8   ;;  %v507_v12 = vld [vmem:[%s1492_s4] sm:$0x3]  ;;  %s956_s27 = smul.u32 48, %s400_s29  ;;  %s738_s21 = sshll.u32 %s376_s15, 4  ;;  %s1402_s21 = int_to_ptr.vmem [resolvable:$true] %s738_s21 }
  0x48   : > { %v412_v10 = vld [vmem:[%s1511_s1] sm:$0x3]  ;;  %605 = vperm.xlu1 %1030, %v601_v9   ;;  %s1400_s29 = scalar_lea.hbm %s1495_s7, %s1500_s17  ;;  %s1061_s18 = scalar_lea.vmem %s1402_s21, 64 }
  0x49   : > { %926 = vmatmul.mubr.msk.f32.vlgmr.msra.gmra.mrb[0].mxu1 %vm419_vm0, %v412_v10  ;;  %930 = vmatmul.mubr.msk.f32.vlgmr.msra.gmra.mrb[0].mxu0 %vm419_vm0, %v599_v11  ;;  %v506_v14 = vld [vmem:[%s1491_s3] sm:$0x3]  ;;  %s1388_s26 = scalar_lea.vmem %s1497_s9, %s956_s27  ;;  %s1404_s27 = scalar_lea.vmem [#allocation6], %s923_s28 }
  0x4a   : > { %951 = vmatpush1.bf16.msra.mxu1 %v946_v7  ;;  %580 = vmatprep.mubr.f32.mxu1 %v1180_v0  ;;  %932 = vst.msk [vmem:[%s1388_s26 + $0x20] ss:$8 sm:$0x3] %vm702_vm1, %v1182_v17  ;;  %p1062_p9 = scmp.ne.s32.totalorder %s1402_s21, %s1061_s18  ;;  %p1512_p11 = scmp.ne.s32.totalorder %s1506_s22, 0 }
  0x4b   : > { %689 = vmatprep.mubr.f32.mxu0 %v1180_v0  ;;  %510 = vperm.xlu0 %1029, %v507_v12   ;;  %s1183_s20 = smov [#allocation5]  }
  0x4c   : > { %610 = vperm.xlu1 %1030, %v602_v13   ;;  %p1063_p0 = pnand %p1062_p9, %p1512_p11  ;;  %s1065_s17 = sshll.u32 %s1183_s20, 4  ;;  %s1066_s17 = int_to_ptr.vmem [resolvable:$false] %s1065_s17 }
  0x4d   : > { %928 = vmatmul.mubr.msk.f32.vlgmr.msra.gmra.mrb[2].mxu1 %vm419_vm0, %v506_v14  ;;  %931 = vmatmul.mubr.msk.f32.gmra.mrb[2].mxu0 %vm419_vm0, %v600_v15  ;;  %s1067_s0 = scalar_lea.vmem %s1066_s17, 128  ;;  %p1068_p13 = scmp.lt.s32.totalorder %s1402_s21, %s1066_s17 }
  0x4e   : > { %p1064_p6 = pneg %p1063_p0  ;;  %p1069_p2 = scmp.lt.s32.totalorder %s1067_s0, %s1061_s18 }
  0x50   : > { %p1070_p5 = por %p1069_p2, %p1068_p13 }
  0x52   : > { %p1071_p4 = pnand %p1070_p5, %p1064_p6 }
  0xc6   : > { %v417_v19 = vpop.permute.xlu0 %416 }
  0xc7   : > { %v606_v18 = vpop.permute.xlu1 %605 }
  0xca   : > { %v511_v29 = vpop.permute.xlu0 %510 }
  0xcb   : > { %v611_v28 = vpop.permute.xlu1 %610 }
 0x11c   : > { %v489_v20 = vpop.f32.mrb[0].mxu1  ;;  %v685_v21 = vpop.f32.mrb[0].mxu0 }
 0x11d   : > { %v490_v22 = vadd.f32 %v489_v20, %v417_v19  ;;  %v491_v23 = vpop.f32.mrb[1].mxu1  ;;  %v686_v24 = vadd.f32 %v685_v21, %v606_v18  ;;  %v687_v25 = vpop.f32.mrb[1].mxu0 }
 0x11e   : > { %v492_v26 = vadd.f32 %v491_v23, %v417_v19  ;;  %v688_v27 = vadd.f32 %v687_v25, %v606_v18 }
 0x11f   : > { %696 = vst [vmem:[%s1388_s26] sm:$0xff] %v686_v24 }
 0x120   : > { %v496_v30 = vcombine.low %v490_v22, %v492_v26  ;;  %697 = vst [vmem:[%s1388_s26 + $0x8] sm:$0xff] %v688_v27  ;;  %v582_v31 = vpop.f32.mrb[2].mxu1  ;;  %v691_v32 = vpop.f32.mrb[2].mxu0 }
 0x121   : > { %v583_v33 = vadd.f32 %v582_v31, %v511_v29  ;;  %v692_v34 = vadd.f32 %v691_v32, %v611_v28  ;;  %v584_v35 = vpop.f32.mrb[3].mxu1  ;;  %v693_v36 = vpop.f32.mrb[3].mxu0 }
 0x122   : > { %v585_v37 = vadd.f32 %v584_v35, %v511_v29  ;;  %v694_v38 = vadd.f32 %v693_v36, %v611_v28  ;;  %927 = vst.sshfl [vmem:[%s376_s15] sm:$0x33 pattern:$0x76325410] %v496_v30 }
 0x123   : > { %698 = vst [vmem:[%s1388_s26 + $0x10] sm:$0xff] %v692_v34 }
 0x124   : > { %1074 = shalt.err (!%p1071_p4)
}
 0x125   : > { %s1075_s28 = scalar_lea.hbm %s1400_s29, 64  ;;  %s1079_s20 = scalar_lea.hbm %s1495_s7, 128 }
 0x126   : > { %p1076_p7 = scmp.ne.s32.totalorder %s1400_s29, %s1075_s28  ;;  %p1080_p1 = scmp.lt.u32.totalorder %s1400_s29, %s1495_s7 }
 0x127   : > { %p1081_p3 = scmp.lt.u32.totalorder %s1079_s20, %s1075_s28  ;;  %p1083_p9 = scmp.lt.u32.totalorder %s1075_s28, %s1400_s29 }
 0x128   : > { %p1077_p10 = pnand %p1076_p7, %p1512_p11 }
 0x129   : > { %p1082_p8 = por %p1081_p3, %p1080_p1 }
 0x12a   : > { %p1078_p12 = pneg %p1077_p10 }
 0x12b   : > { %p1084_p0 = por %p1083_p9, %p1082_p8 }
 0x12d   : > { %p1085_p6 = pnand %p1084_p0, %p1078_p12 }
 0x12f   : > { %1088 = shalt.err (!%p1085_p6)
}
 0x130   : > { %959 = dma.vmem_to_hbm [thread:$0]  (%p1512_p11), %s1402_s21, 64, %s1400_s29, %s708_s25   ;;  %v589_v39 = vcombine.low %v583_v33, %v585_v37  ;;  %699 = vst [vmem:[%s1388_s26 + $0x18] sm:$0xff] %v694_v38 }
 0x131   : > { %s1513_s0 = sshll.u32 %s1167_s12, 6  ;;  %s1514_s28 = sshll.u32 %s1404_s27, 4  ;;  %s1440_s28 = int_to_ptr.vmem [resolvable:$true] %s1514_s28 }
 0x132   : > { %s1436_s18 = scalar_lea.hbm %s1496_s8, %s1513_s0  ;;  %929 = vst.sshfl [vmem:[%s1404_s27] sm:$0x33 pattern:$0x76325410] %v589_v39  ;;  %s713_s15 = scalar_lea.sflag [#allocation7], %s1347_s16 }
 0x133   : > { %s1089_s20 = scalar_lea.vmem %s1440_s28, 64  ;;  %s1184_s26 = smov [#allocation6]  }
 0x134   : > { %p1090_p13 = scmp.ne.s32.totalorder %s1440_s28, %s1089_s20  ;;  %s1093_s12 = sshll.u32 %s1184_s26, 4  ;;  %s1094_s12 = int_to_ptr.vmem [resolvable:$false] %s1093_s12 }
 0x135   : > { %s1095_s21 = scalar_lea.vmem %s1094_s12, 128  ;;  %p1096_p4 = scmp.lt.s32.totalorder %s1440_s28, %s1094_s12 }
 0x136   : > { %p1091_p2 = pnand %p1090_p13, %p1512_p11  ;;  %p1097_p7 = scmp.lt.s32.totalorder %s1095_s21, %s1089_s20 }
 0x138   : > { %p1092_p5 = pneg %p1091_p2  ;;  %p1098_p10 = por %p1097_p7, %p1096_p4 }
 0x13a   : > { %p1099_p12 = pnand %p1098_p10, %p1092_p5 }
 0x13c   : > { %1102 = shalt.err (!%p1099_p12)
}
 0x13d   : > { %s1103_s16 = scalar_lea.hbm %s1436_s18, 64  ;;  %s1107_s25 = scalar_lea.hbm %s1496_s8, 128 }
 0x13e   : > { %p1104_p1 = scmp.ne.s32.totalorder %s1436_s18, %s1103_s16  ;;  %p1108_p9 = scmp.lt.u32.totalorder %s1436_s18, %s1496_s8 }
 0x13f   : > { %p1109_p0 = scmp.lt.u32.totalorder %s1107_s25, %s1103_s16  ;;  %p1111_p13 = scmp.lt.u32.totalorder %s1103_s16, %s1436_s18 }
 0x140   : > { %p1105_p3 = pnand %p1104_p1, %p1512_p11 }
 0x141   : > { %p1110_p6 = por %p1109_p0, %p1108_p9 }
 0x142   : > { %p1106_p8 = pneg %p1105_p3 }
 0x143   : > { %p1112_p2 = por %p1111_p13, %p1110_p6 }
 0x145   : > { %p1113_p5 = pnand %p1112_p2, %p1106_p8 }
 0x147   : > { %1116 = shalt.err (!%p1113_p5)
}
 0x148   : > { %960 = dma.vmem_to_hbm [thread:$0]  (%p1512_p11), %s1440_s28, 64, %s1436_s18, %s713_s15  }
 0x149 PF: > { %s770_s1 = sand.u32 1, %s1155_s30   ;;  %p1515_p4 = scmp.ne.s32.totalorder %s1507_s24, 0 }
 0x14a   : > { %p1516_p7 = scmp.ge.s32.totalorder %s1175_s14, 2  ;;  %s771_s19 = scalar_lea.sflag [#allocation4], %s770_s1 }
 0x14c   : > { %p968_p10 = pnand %p1516_p7, %p1515_p4 }
 0x14e   : > { %1146 = dma.done.wait (!%p968_p10), %s771_s19, 64  }
 0x14f   : > { %1148 = vsyncadd (!%p968_p10), %s771_s19, 4294967232  ;;  %s780_s20 = scalar_lea.sflag [#allocation7], %s770_s1 }
 0x150   : > { %1150 = dma.done.wait (!%p968_p10), %s780_s20, 64  }
 0x151   : > { %1152 = vsyncadd (!%p968_p10), %s780_s20, 4294967232  ;;  %s29_s14 = sadd.s32 1, %s1175_s14   ;;  %s1517_s22 = sld [smem:[#allocation11_spill]] }
 0x152   : > { %p26_p12 = scmp.ge.s32.totalorder %s29_s14, 4   ;;  %s1518_s30 = smov %s1159_s10 }
 0x153   : > { %s1519_s10 = smov %s1163_s11  ;;  %s1520_s11 = smov %s1291_s23 }
 0x154   : > { %s1521_s12 = smov %s1171_s13  ;;  %28 = sbr.rel (!%p26_p12) target bundleno = 11 (0xb), region = 123 }
 0x157   : > { %s1522_s13 = smov %s1517_s22 }
 0x15b   :  { %797 = vsyncpa [#allocation3], 1 }
 0x15c   :  { %799 = vsyncpa [#allocation3 + $0x1], 1 }
 0x15d   :  { %800 = vsyncpa [#allocation4], 1 }
 0x15e   :  { %802 = vsyncpa [#allocation4 + $0x1], 1 }
 0x15f   :  { %803 = vsyncpa [#allocation7], 1 }
 0x160   :  { %805 = vsyncpa [#allocation7 + $0x1], 1 }

</bundles_post_ra>
